<compile_context>
chip_gen: v7x
topology: tpu7x:2x2x1
jax: 0.10.0
libtpu: 0.0.40
codegen_flags: <defaults>
</compile_context>

<pallas_src>
import functools

import jax
import jax.numpy as jnp
import numpy as np
from jax.experimental import pallas as pl
from jax.experimental.pallas import tpu as pltpu

TRANSFORMER_DIM = 768          # bert-base-cased pooler_output size
HIDDEN = 256
MAX_TILE_B = 2048              # multiple of 256; f32 x double-buffered ~ 12 MiB
VMEM_LIMIT_BYTES = 32 * 1024 * 1024   # explicit so v5e (16 MiB default) also fits


def _cdiv(a, b):
    return -(-a // b)


def _round_up(x, m):
    return ((x + m - 1) // m) * m


def _choose_tile(batch, max_tile_b):
    """Batch-tile policy.

    * batch <= 256: one (padded) tile, rounded to 16 rows.
    * batch  > 256: an even number of >=256-row tiles so both v7x
      TensorCores get work and there is no half-idle odd tail step.
    """
    if batch <= 256:
        return min(_round_up(batch, 16), _round_up(max_tile_b, 16))
    num_tiles = max(2, _cdiv(batch, max_tile_b))
    if num_tiles % 2:
        num_tiles += 1
    tile_b = _round_up(_cdiv(batch, num_tiles), 256)
    return min(tile_b, _round_up(max_tile_b, 256))


def _regression_kernel(x_ref, grade_ref,
                       w1_ref, b1_ref, w2_ref, b2_ref, w3_ref, b3_ref,
                       ypred_ref, loss_ref, *, batch):
    """One batch tile of the fused MLP head + per-tile MSE partial sum.

    x_ref     : [TILE_B, 768] (native dtype, cast to bf16 in-body)
    grade_ref : [TILE_B, 1]   f32   regression targets
    w1_ref    : [768, 256] bf16, b1_ref: [1, 256] f32
    w2_ref    : [256, 256] bf16, b2_ref: [1, 256] f32
    w3_ref    : [1, 256]   f32,  b3_ref: [1, 1]   f32   (lout as a row vector)
    ypred_ref : [TILE_B, 1] f32
    loss_ref  : [1, 1, 1]   f32   sum of squared errors over this tile's valid rows
    """
    tile_b = x_ref.shape[0]

    # bf16 MXU operands (in-kernel cast -> no standalone HBM cast pass),
    # f32 accumulation, f32 VPU math for bias/ReLU/loss.
    x = x_ref[...].astype(jnp.bfloat16)

    # h1 = relu(x @ W1 + b1)
    h1 = jnp.dot(x, w1_ref[...], preferred_element_type=jnp.float32) + b1_ref[...]
    h1 = jnp.maximum(h1, 0.0)

    # h2 = relu(h1 @ W2 + b2)
    h2 = jnp.dot(h1.astype(jnp.bfloat16), w2_ref[...],
                 preferred_element_type=jnp.float32) + b2_ref[...]
    h2 = jnp.maximum(h2, 0.0)

    # y_pred = lout(h2): N=1 matmul is a degenerate MXU pass, so do a VPU
    # multiply + cross-lane reduction instead.
    y = jnp.sum(h2 * w3_ref[...], axis=-1, keepdims=True) + b3_ref[...]
    ypred_ref[...] = y

    # Per-tile partial MSE numerator; mask padded rows of a ragged / padded tile.
    row = (pl.program_id(0) * tile_b
           + jax.lax.broadcasted_iota(jnp.int32, (tile_b, 1), 0))
    diff = jnp.where(row < batch, y - grade_ref[...], 0.0)
    loss_ref[...] = jnp.sum(diff * diff).reshape(1, 1, 1)


def prepare_params(params):
    """One-time parameter prep (hoisted out of the per-call path).

    Takes torch-style (W[in,out], b[out]) params and returns the kernel
    layout: bf16 w1/w2, f32 biases as rows, lout weight as a [1,256] row.
    """
    w1, b1, w2, b2, w3, b3 = params
    return (jnp.asarray(w1, jnp.bfloat16),
            jnp.asarray(b1, jnp.float32).reshape(1, HIDDEN),
            jnp.asarray(w2, jnp.bfloat16),
            jnp.asarray(b2, jnp.float32).reshape(1, HIDDEN),
            jnp.asarray(w3, jnp.float32).reshape(1, HIDDEN),
            jnp.asarray(b3, jnp.float32).reshape(1, 1))


@functools.partial(jax.jit, static_argnames=("max_tile_b",))
def regression_model_forward(sentence_emb, grade, prepared_params, *,
                             max_tile_b=MAX_TILE_B):
    """Pallas-backed RegressionModel.forward (post-transformer).

    sentence_emb : [B, 768] f32 (or bf16)   pooled sentence embeddings
    grade        : [B]      float           regression targets
    prepared_params : output of prepare_params()
    returns (loss: scalar f32, y_pred: [B] f32)
    """
    B = sentence_emb.shape[0]
    w1, b1, w2, b2, w3, b3 = prepared_params

    grade2d = grade.reshape(B, 1).astype(jnp.float32)

    tile_b = _choose_tile(B, max_tile_b)
    num_tiles = _cdiv(B, tile_b)

    def resident(shape):
        # Constant index_map -> weight block stays resident in VMEM across the grid.
        return pl.BlockSpec(shape, lambda i: (0, 0))

    x_bytes = jnp.dtype(sentence_emb.dtype).itemsize
    flops = 2 * B * (TRANSFORMER_DIM * HIDDEN + HIDDEN * HIDDEN + HIDDEN)
    bytes_accessed = (B * TRANSFORMER_DIM * x_bytes + 2 * B * 4 + num_tiles * 4
                      + TRANSFORMER_DIM * HIDDEN * 2 + HIDDEN * HIDDEN * 2
                      + 3 * HIDDEN * 4)

    y_pred, loss_parts = pl.pallas_call(
        functools.partial(_regression_kernel, batch=B),
        grid=(num_tiles,),
        in_specs=[
            pl.BlockSpec((tile_b, TRANSFORMER_DIM), lambda i: (i, 0)),   # x (native dtype)
            pl.BlockSpec((tile_b, 1), lambda i: (i, 0)),                 # grade
            resident((TRANSFORMER_DIM, HIDDEN)),                         # w1 (bf16)
            resident((1, HIDDEN)),                                       # b1
            resident((HIDDEN, HIDDEN)),                                  # w2 (bf16)
            resident((1, HIDDEN)),                                       # b2
            resident((1, HIDDEN)),                                       # w3 (row, f32)
            resident((1, 1)),                                            # b3
        ],
        out_specs=(
            pl.BlockSpec((tile_b, 1), lambda i: (i, 0)),                 # y_pred
            pl.BlockSpec((1, 1, 1), lambda i: (i, 0, 0)),                # per-tile SSE
        ),
        out_shape=(
            jax.ShapeDtypeStruct((B, 1), jnp.float32),
            jax.ShapeDtypeStruct((num_tiles, 1, 1), jnp.float32),
        ),
        compiler_params=pltpu.CompilerParams(
            dimension_semantics=("parallel",),
            vmem_limit_bytes=VMEM_LIMIT_BYTES),
        cost_estimate=pl.CostEstimate(
            flops=flops, transcendentals=0, bytes_accessed=bytes_accessed),
    )(sentence_emb, grade2d, w1, b1, w2, b2, w3, b3)

    loss = jnp.sum(loss_parts) / B
    return loss, y_pred[:, 0]


def init_params(key):
    """Deterministic init mimicking torch.nn.Linear (uniform +/- 1/sqrt(fan_in)).

    Weights are stored [in_features, out_features] (transposed vs. PyTorch)
    to match the in-kernel `x @ W` layout.
    """
    def linear(key, fan_in, fan_out):
        kw, kb = jax.random.split(key)
        bound = 1.0 / np.sqrt(fan_in)
        w = jax.random.uniform(kw, (fan_in, fan_out), jnp.float32, -bound, bound)
        b = jax.random.uniform(kb, (fan_out,), jnp.float32, -bound, bound)
        return w, b

    k1, k2, k3 = jax.random.split(key, 3)
    w1, b1 = linear(k1, TRANSFORMER_DIM, HIDDEN)   # l1: 768 -> 256
    w2, b2 = linear(k2, HIDDEN, HIDDEN)            # l2: 256 -> 256
    w3, b3 = linear(k3, HIDDEN, 1)                 # lout: 256 -> 1
    return (w1, b1, w2, b2, w3, b3)


def _reference_forward(sentence_emb, grade, raw_params):
    """Pure-jnp reference with the same bf16 operand casts as the kernel."""
    w1, b1, w2, b2, w3, b3 = raw_params
    x = sentence_emb.astype(jnp.bfloat16)
    h1 = jnp.maximum(
        jnp.dot(x, w1.astype(jnp.bfloat16),
                preferred_element_type=jnp.float32) + b1, 0.0)
    h2 = jnp.maximum(
        jnp.dot(h1.astype(jnp.bfloat16), w2.astype(jnp.bfloat16),
                preferred_element_type=jnp.float32) + b2, 0.0)
    y = (jnp.dot(h2, w3, preferred_element_type=jnp.float32) + b3)[:, 0]
    loss = jnp.mean((y - grade.astype(jnp.float32)) ** 2)
    return loss, y


if __name__ == "__main__":
    # TODO(synk): the frozen pretrained transformer (AutoModel.from_pretrained)
    # has no Pallas equivalent; the pooled sentence embedding is supplied
    # directly as the kernel input (default config => num_features == 768).
    key = jax.random.PRNGKey(0)
    k_params, k_x, k_g = jax.random.split(key, 3)

    raw_params = init_params(k_params)
    params = prepare_params(raw_params)   # one-time cast/reshape, outside forward

    # Case 1: tiny batch, single padded grid step (tile rounded to 16 rows).
    B1 = 8
    x1 = jax.random.normal(k_x, (B1, TRANSFORMER_DIM), jnp.float32)
    g1 = jax.random.uniform(k_g, (B1,), jnp.float32, 0.0, 5.0)
    loss1, y1 = regression_model_forward(x1, g1, params)
    jax.block_until_ready((loss1, y1))
    ref_loss1, ref_y1 = _reference_forward(x1, g1, raw_params)
    np.testing.assert_allclose(np.asarray(y1), np.asarray(ref_y1), rtol=1e-2, atol=1e-2)
    np.testing.assert_allclose(np.asarray(loss1), np.asarray(ref_loss1), rtol=1e-2, atol=1e-2)
    assert y1.shape == (B1,) and loss1.shape == ()

    # Case 2: small max_tile_b to exercise the batch grid, resident weights
    # and the ragged-tail mask (2 tiles of 16 rows, last tile 4 valid rows).
    B2 = 20
    x2 = jax.random.normal(jax.random.fold_in(k_x, 1), (B2, TRANSFORMER_DIM), jnp.float32)
    g2 = jax.random.uniform(jax.random.fold_in(k_g, 1), (B2,), jnp.float32, 0.0, 5.0)
    loss2, y2 = regression_model_forward(x2, g2, params, max_tile_b=8)
    jax.block_until_ready((loss2, y2))
    ref_loss2, ref_y2 = _reference_forward(x2, g2, raw_params)
    np.testing.assert_allclose(np.asarray(y2), np.asarray(ref_y2), rtol=1e-2, atol=1e-2)
    np.testing.assert_allclose(np.asarray(loss2), np.asarray(ref_loss2), rtol=1e-2, atol=1e-2)
    assert y2.shape == (B2,) and loss2.shape == ()

    # Case 3: B > 256 path -> even split into 2 tiles of 256 rows (keeps both
    # v7x TensorCores busy under dimension_semantics=("parallel",)).
    B3 = 300
    x3 = jax.random.normal(jax.random.fold_in(k_x, 2), (B3, TRANSFORMER_DIM), jnp.float32)
    g3 = jax.random.uniform(jax.random.fold_in(k_g, 2), (B3,), jnp.float32, 0.0, 5.0)
    loss3, y3 = regression_model_forward(x3, g3, params)
    jax.block_until_ready((loss3, y3))
    ref_loss3, ref_y3 = _reference_forward(x3, g3, raw_params)
    np.testing.assert_allclose(np.asarray(y3), np.asarray(ref_y3), rtol=1e-2, atol=1e-2)
    np.testing.assert_allclose(np.asarray(loss3), np.asarray(ref_loss3), rtol=1e-2, atol=1e-2)
    assert y3.shape == (B3,) and loss3.shape == ()

    print("KERNEL_OK")
</pallas_src>

<mosaic_0001>
module attributes {stable_mosaic.version = 11 : i64} {
  func.func @_regression_kernel(%arg0: i32, %arg1: memref<16x768xf32, #tpu.memory_space<vmem>>, %arg2: memref<16x1xf32, #tpu.memory_space<vmem>>, %arg3: memref<768x256xbf16, #tpu.memory_space<vmem>>, %arg4: memref<1x256xf32, #tpu.memory_space<vmem>>, %arg5: memref<256x256xbf16, #tpu.memory_space<vmem>>, %arg6: memref<1x256xf32, #tpu.memory_space<vmem>>, %arg7: memref<1x256xf32, #tpu.memory_space<vmem>>, %arg8: memref<1x1xf32, #tpu.memory_space<vmem>>, %arg9: memref<16x1xf32, #tpu.memory_space<vmem>>, %arg10: memref<1x1x1xf32, #tpu.memory_space<vmem>>) attributes {dimension_semantics = [#tpu.dimension_semantics<parallel>], iteration_bounds = array<i64: 1>, scalar_prefetch = 0 : i64, scratch_operands = 0 : i64, tpu.core_type = #tpu.core_type<tc>, window_params = [{transform_indices = @transform_0, window_bounds = array<i64: 16, 768>}, {transform_indices = @transform_1, window_bounds = array<i64: 16, 1>}, {pipeline_mode = #tpu.pipeline_mode<synchronous>, transform_indices = @transform_2, window_bounds = array<i64: 768, 256>}, {pipeline_mode = #tpu.pipeline_mode<synchronous>, transform_indices = @transform_3, window_bounds = array<i64: 1, 256>}, {pipeline_mode = #tpu.pipeline_mode<synchronous>, transform_indices = @transform_4, window_bounds = array<i64: 256, 256>}, {pipeline_mode = #tpu.pipeline_mode<synchronous>, transform_indices = @transform_5, window_bounds = array<i64: 1, 256>}, {pipeline_mode = #tpu.pipeline_mode<synchronous>, transform_indices = @transform_6, window_bounds = array<i64: 1, 256>}, {pipeline_mode = #tpu.pipeline_mode<synchronous>, transform_indices = @transform_7, window_bounds = array<i64: 1, 1>}, {transform_indices = @transform_8, window_bounds = array<i64: 16, 1>}, {transform_indices = @transform_9, window_bounds = array<i64: 1, 1, 1>}]} {
    %c0 = arith.constant 0 : index
    %c0_0 = arith.constant 0 : index
    %0 = vector.load %arg1[%c0, %c0_0] : memref<16x768xf32, #tpu.memory_space<vmem>>, vector<16x768xf32>
    %1 = arith.truncf %0 : vector<16x768xf32> to vector<16x768xbf16>
    %c0_1 = arith.constant 0 : index
    %c0_2 = arith.constant 0 : index
    %2 = vector.load %arg3[%c0_1, %c0_2] : memref<768x256xbf16, #tpu.memory_space<vmem>>, vector<768x256xbf16>
    %cst = arith.constant dense<0.000000e+00> : vector<16x256xf32>
    %3 = tpu.matmul %1, %2, %cst {dimension_numbers = #tpu.dot_dimension_numbers<[1], [0], [0], [1], [0, 0, 1, 1], [], []>} : vector<16x768xbf16>, vector<768x256xbf16>, vector<16x256xf32> -> vector<16x256xf32>
    %c0_3 = arith.constant 0 : index
    %c0_4 = arith.constant 0 : index
    %4 = vector.load %arg4[%c0_3, %c0_4] : memref<1x256xf32, #tpu.memory_space<vmem>>, vector<1x256xf32>
    %5 = vector.broadcast %4 : vector<1x256xf32> to vector<16x256xf32>
    %6 = arith.addf %3, %5 : vector<16x256xf32>
    %cst_5 = arith.constant 0.000000e+00 : f32
    %7 = vector.broadcast %cst_5 : f32 to vector<16x256xf32>
    %8 = arith.maximumf %6, %7 : vector<16x256xf32>
    %9 = arith.truncf %8 : vector<16x256xf32> to vector<16x256xbf16>
    %c0_6 = arith.constant 0 : index
    %c0_7 = arith.constant 0 : index
    %10 = vector.load %arg5[%c0_6, %c0_7] : memref<256x256xbf16, #tpu.memory_space<vmem>>, vector<256x256xbf16>
    %cst_8 = arith.constant dense<0.000000e+00> : vector<16x256xf32>
    %11 = tpu.matmul %9, %10, %cst_8 {dimension_numbers = #tpu.dot_dimension_numbers<[1], [0], [0], [1], [0, 0, 1, 1], [], []>} : vector<16x256xbf16>, vector<256x256xbf16>, vector<16x256xf32> -> vector<16x256xf32>
    %c0_9 = arith.constant 0 : index
    %c0_10 = arith.constant 0 : index
    %12 = vector.load %arg6[%c0_9, %c0_10] : memref<1x256xf32, #tpu.memory_space<vmem>>, vector<1x256xf32>
    %13 = vector.broadcast %12 : vector<1x256xf32> to vector<16x256xf32>
    %14 = arith.addf %11, %13 : vector<16x256xf32>
    %cst_11 = arith.constant 0.000000e+00 : f32
    %15 = vector.broadcast %cst_11 : f32 to vector<16x256xf32>
    %16 = arith.maximumf %14, %15 : vector<16x256xf32>
    %c0_12 = arith.constant 0 : index
    %c0_13 = arith.constant 0 : index
    %17 = vector.load %arg7[%c0_12, %c0_13] : memref<1x256xf32, #tpu.memory_space<vmem>>, vector<1x256xf32>
    %18 = vector.broadcast %17 : vector<1x256xf32> to vector<16x256xf32>
    %19 = arith.mulf %16, %18 : vector<16x256xf32>
    %cst_14 = arith.constant dense<0.000000e+00> : vector<16xf32>
    %20 = vector.multi_reduction <add>, %19, %cst_14 [1] : vector<16x256xf32> to vector<16xf32>
    %21 = vector.shape_cast %20 : vector<16xf32> to vector<16x1xf32>
    %c0_15 = arith.constant 0 : index
    %c0_16 = arith.constant 0 : index
    %22 = vector.load %arg8[%c0_15, %c0_16] : memref<1x1xf32, #tpu.memory_space<vmem>>, vector<1x1xf32>
    %23 = vector.broadcast %22 : vector<1x1xf32> to vector<16x1xf32>
    %24 = arith.addf %21, %23 : vector<16x1xf32>
    %c0_17 = arith.constant 0 : index
    %c0_18 = arith.constant 0 : index
    %25 = vector.load %arg9[%c0_17, %c0_18] : memref<16x1xf32, #tpu.memory_space<vmem>>, vector<16x1xf32>
    tpu.vector_store %arg9[%c0_17, %c0_18], %24 {strides = array<i32>} : memref<16x1xf32, #tpu.memory_space<vmem>>, vector<16x1xf32>,
    %c16_i32 = arith.constant 16 : i32
    %26 = arith.muli %arg0, %c16_i32 : i32
    %27 = tpu.iota {dimensions = array<i32: 0>} : vector<16x1xi32>
    %28 = vector.broadcast %26 : i32 to vector<16x1xi32>
    %29 = arith.addi %28, %27 : vector<16x1xi32>
    %c8_i32 = arith.constant 8 : i32
    %30 = vector.broadcast %c8_i32 : i32 to vector<16x1xi32>
    %31 = arith.cmpi slt, %29, %30 : vector<16x1xi32>
    %c0_19 = arith.constant 0 : index
    %c0_20 = arith.constant 0 : index
    %32 = vector.load %arg2[%c0_19, %c0_20] : memref<16x1xf32, #tpu.memory_space<vmem>>, vector<16x1xf32>
    %33 = arith.subf %24, %32 : vector<16x1xf32>
    %cst_21 = arith.constant 0.000000e+00 : f32
    %34 = vector.broadcast %cst_21 : f32 to vector<16x1xf32>
    %35 = arith.select %31, %33, %34 : vector<16x1xi1>, vector<16x1xf32>
    %36 = arith.mulf %35, %35 : vector<16x1xf32>
    %37 = vector.shape_cast %36 : vector<16x1xf32> to vector<1x16x1xf32>
    %cst_22 = arith.constant dense<0.000000e+00> : vector<1xf32>
    %38 = vector.multi_reduction <add>, %37, %cst_22 [1, 2] : vector<1x16x1xf32> to vector<1xf32>
    %39 = vector.shape_cast %38 : vector<1xf32> to vector<1x1x1xf32>
    %40 = vector.extract %39[0, 0, 0] : f32 from vector<1x1x1xf32>
    %41 = vector.broadcast %40 : f32 to vector<1x1x1xf32>
    %c0_23 = arith.constant 0 : index
    %c0_24 = arith.constant 0 : index
    %c0_25 = arith.constant 0 : index
    %42 = vector.load %arg10[%c0_23, %c0_24, %c0_25] : memref<1x1x1xf32, #tpu.memory_space<vmem>>, vector<1x1x1xf32>
    tpu.vector_store %arg10[%c0_23, %c0_24, %c0_25], %41 {strides = array<i32>} : memref<1x1x1xf32, #tpu.memory_space<vmem>>, vector<1x1x1xf32>,
    return
  }
  func.func @transform_0(%arg0: i32) -> (i32, i32) {
    %c0_i32 = arith.constant 0 : i32
    %c0_i32_0 = arith.constant 0 : i32
    return %arg0, %c0_i32 : i32, i32
  }
  func.func @transform_1(%arg0: i32) -> (i32, i32) {
    %c0_i32 = arith.constant 0 : i32
    %c0_i32_0 = arith.constant 0 : i32
    return %arg0, %c0_i32 : i32, i32
  }
  func.func @transform_2(%arg0: i32) -> (i32, i32) {
    %c0_i32 = arith.constant 0 : i32
    %c0_i32_0 = arith.constant 0 : i32
    %c0_i32_1 = arith.constant 0 : i32
    return %c0_i32, %c0_i32_0 : i32, i32
  }
  func.func @transform_3(%arg0: i32) -> (i32, i32) {
    %c0_i32 = arith.constant 0 : i32
    %c0_i32_0 = arith.constant 0 : i32
    %c0_i32_1 = arith.constant 0 : i32
    return %c0_i32, %c0_i32_0 : i32, i32
  }
  func.func @transform_4(%arg0: i32) -> (i32, i32) {
    %c0_i32 = arith.constant 0 : i32
    %c0_i32_0 = arith.constant 0 : i32
    %c0_i32_1 = arith.constant 0 : i32
    return %c0_i32, %c0_i32_0 : i32, i32
  }
  func.func @transform_5(%arg0: i32) -> (i32, i32) {
    %c0_i32 = arith.constant 0 : i32
    %c0_i32_0 = arith.constant 0 : i32
    %c0_i32_1 = arith.constant 0 : i32
    return %c0_i32, %c0_i32_0 : i32, i32
  }
  func.func @transform_6(%arg0: i32) -> (i32, i32) {
    %c0_i32 = arith.constant 0 : i32
    %c0_i32_0 = arith.constant 0 : i32
    %c0_i32_1 = arith.constant 0 : i32
    return %c0_i32, %c0_i32_0 : i32, i32
  }
  func.func @transform_7(%arg0: i32) -> (i32, i32) {
    %c0_i32 = arith.constant 0 : i32
    %c0_i32_0 = arith.constant 0 : i32
    %c0_i32_1 = arith.constant 0 : i32
    return %c0_i32, %c0_i32_0 : i32, i32
  }
  func.func @transform_8(%arg0: i32) -> (i32, i32) {
    %c0_i32 = arith.constant 0 : i32
    %c0_i32_0 = arith.constant 0 : i32
    return %arg0, %c0_i32 : i32, i32
  }
  func.func @transform_9(%arg0: i32) -> (i32, i32, i32) {
    %c0_i32 = arith.constant 0 : i32
    %c0_i32_0 = arith.constant 0 : i32
    %c0_i32_1 = arith.constant 0 : i32
    return %arg0, %c0_i32, %c0_i32_0 : i32, i32, i32
  }
}

</mosaic_0001>

<bundles_post_ra>
// kernel: regression_model_forward.1
= control target key start
LH: loop header
LB: loop body
LE: loop exit
PB: predicated region body
PF: predicated region fallthrough
CT: control target
= control target key end

     0   :  { %s1756_s0 = inlined_call_operand.hbm [shape: f32[8,768], index: 0, kind: input, shape index: {}]   ;;  %s1757_s1 = inlined_call_operand.vmem [shape: f32[8,1], index: 1, kind: input, shape index: {}]   ;;  %s1758_s2 = inlined_call_operand.hbm [shape: bf16[768,256], index: 2, kind: input, shape index: {}]   ;;  %s1759_s3 = inlined_call_operand.vmem [shape: f32[1,256], index: 3, kind: input, shape index: {}]   ;;  %s1760_s4 = inlined_call_operand.hbm [shape: bf16[256,256], index: 4, kind: input, shape index: {}]   ;;  %s1761_s5 = inlined_call_operand.vmem [shape: f32[1,256], index: 5, kind: input, shape index: {}]   ;;  %s1762_s6 = inlined_call_operand.vmem [shape: f32[1,256], index: 6, kind: input, shape index: {}]   ;;  %s1763_s7 = inlined_call_operand.<no memory space> [shape: f32[1,1], index: 7, kind: input, shape index: {}]   ;;  %s1764_s8 = inlined_call_operand.vmem [shape: f32[8,1], index: 8, kind: output, shape index: {0}]   ;;  %s1765_s9 = inlined_call_operand.hbm [shape: f32[1,1,1], index: 9, kind: output, shape index: {1}]  }
   0x1   :  { %v15_v0 = vstv %s1763_s7 }
   0x2   :  { %16 = vst [vmem:[#allocation2] sm:$0x1] %v15_v0 }
   0x3   :  { %17 = vsyncpa [#allocation4], 0 }
   0x4   :  { %18 = vsyncpa [#allocation7], 0 }
   0x5   :  { %19 = vsyncpa [#allocation5], 0 }
   0x6   :  { %24 = vsyncadd [#allocation4], 768  ;;  %s1626_s11 = smov [#allocation6]   ;;  %s1532_s15 = scalar_lea.hbm %s1758_s2, 12288 }
   0x7   :  { %s39_s12 = sshll.u32 %s1626_s11, 4  ;;  %p1533_p0 = scmp.ne.s32.totalorder %s1758_s2, %s1532_s15  ;;  %s40_s12 = int_to_ptr.vmem [resolvable:$true] %s39_s12 }
   0x8   :  { %p1536_p1 = scmp.lt.u32.totalorder %s1532_s15, %s1758_s2 }
   0xa   :  { %p1538_p2 = pnand %p1536_p1, %p1533_p0 }
   0xc   :  { %1541 = shalt.err (!%p1538_p2)
}
   0xd   :  { %s1542_s7 = scalar_lea.vmem %s40_s12, 12288  ;;  %p1547_p4 = scmp.lt.s32.totalorder %s40_s12, %s40_s12 }
   0xe   :  { %p1543_p3 = scmp.ne.s32.totalorder %s40_s12, %s1542_s7  ;;  %p1548_p5 = scmp.lt.s32.totalorder %s1542_s7, %s1542_s7 }
  0x10   :  { %p1549_p6 = por %p1548_p5, %p1547_p4 }
  0x12   :  { %p1550_p7 = pnand %p1549_p6, %p1543_p3 }
  0x14   :  { %1553 = shalt.err (!%p1550_p7)
}
  0x15   :  { %s1627_s20 = smov 128   ;;  %s1628_s21 = smov 8  }
  0x16   :  { %45 = dma.hbm_to_vmem [thread:$0]  %s1758_s2, 12288, %s40_s12, [#allocation7], %s1627_s20, %s1627_s20, %s1628_s21  }
  0x17   :  { %s1629_s24 = smov [#allocation3]   ;;  %s1554_s28 = scalar_lea.hbm %s1756_s0, 768 }
  0x18   :  { %s25_s25 = sshll.u32 %s1629_s24, 4  ;;  %p1555_p8 = scmp.ne.s32.totalorder %s1756_s0, %s1554_s28  ;;  %s26_s25 = int_to_ptr.vmem [resolvable:$true] %s25_s25 }
  0x19   :  { %p1558_p9 = scmp.lt.u32.totalorder %s1554_s28, %s1756_s0 }
  0x1b   :  { %p1560_p10 = pnand %p1558_p9, %p1555_p8 }
  0x1d   :  { %1563 = shalt.err (!%p1560_p10)
}
  0x1e   :  { %s1564_s13 = scalar_lea.vmem %s26_s25, 768  ;;  %s1568_s2 = scalar_lea.vmem %s26_s25, 1536 }
  0x1f   :  { %p1565_p11 = scmp.ne.s32.totalorder %s26_s25, %s1564_s13  ;;  %p1569_p12 = scmp.lt.s32.totalorder %s26_s25, %s26_s25 }
  0x20   :  { %p1570_p13 = scmp.lt.s32.totalorder %s1568_s2, %s1564_s13 }
  0x22   :  { %p1571_p0 = por %p1570_p13, %p1569_p12 }
  0x24   :  { %p1572_p1 = pnand %p1571_p0, %p1565_p11 }
  0x26   :  { %1575 = shalt.err (!%p1572_p1)
}
  0x27   :  { %s1630_s12 = smov 768   ;;  %s1631_s14 = smov 48  }
  0x28   :  { %31 = dma.hbm_to_vmem [thread:$0]  %s1756_s0, 768, %s26_s25, [#allocation4], %s1630_s12, %s1630_s12, %s1631_s14  }
  0x29   :  { %s1632_s17 = smov [#allocation8]   ;;  %s1576_s22 = scalar_lea.hbm %s1760_s4, 4096 }
  0x2a   :  { %s53_s18 = sshll.u32 %s1632_s17, 4  ;;  %p1577_p2 = scmp.ne.s32.totalorder %s1760_s4, %s1576_s22  ;;  %s54_s18 = int_to_ptr.vmem [resolvable:$true] %s53_s18 }
  0x2b   :  { %p1580_p3 = scmp.lt.u32.totalorder %s1576_s22, %s1760_s4 }
  0x2d   :  { %p1582_p4 = pnand %p1580_p3, %p1577_p2 }
  0x2f   :  { %1585 = shalt.err (!%p1582_p4)
}
  0x30   :  { %s1586_s28 = scalar_lea.vmem %s54_s18, 4096  ;;  %p1591_p6 = scmp.lt.s32.totalorder %s54_s18, %s54_s18 }
  0x31   :  { %p1587_p5 = scmp.ne.s32.totalorder %s54_s18, %s1586_s28  ;;  %p1592_p7 = scmp.lt.s32.totalorder %s1586_s28, %s1586_s28 }
  0x33   :  { %p1593_p8 = por %p1592_p7, %p1591_p6 }
  0x35   :  { %p1594_p9 = pnand %p1593_p8, %p1587_p5 }
  0x37   :  { %1597 = shalt.err (!%p1594_p9)
}
  0x38   :  { %59 = dma.hbm_to_vmem [thread:$0]  %s1760_s4, 4096, %s54_s18, [#allocation7], %s1627_s20, %s1627_s20, %s1628_s21  }
  0x39   :  { %1620 = dma.done.wait [#allocation4], 1536  }
  0x3a   :  { %1621 = vsyncadd [#allocation4], 4294965760 }
  0x3b   :  { %1622 = dma.done.wait [#allocation7], 16384  }
  0x3c   :  { %1623 = vsyncadd [#allocation7], 4294950912  ;;  %v1340_v1 = vld [vmem:[#allocation6 + $0x104] ss:$8 sps:$4 sm:$0xff]   ;;  %v1342_v2 = vld [vmem:[#allocation6 + $0x100] ss:$8 sps:$4 sm:$0xff]  }
  0x3d   :  { %724 = vmatprep.subr.bf16.mxu0 %v1340_v1  ;;  %v1343_v3 = vld [vmem:[#allocation6 + $0x114] ss:$8 sps:$4 sm:$0xff]   ;;  %v1345_v4 = vld [vmem:[#allocation6 + $0x110] ss:$8 sps:$4 sm:$0xff]   ;;  %v1346_v5 = vld [vmem:[#allocation6 + $0x124] ss:$8 sps:$4 sm:$0xff]  }
  0x3e   :  { %725 = vmatpush1.bf16.msra.mxu0 %v1342_v2  ;;  %v1348_v6 = vld [vmem:[#allocation6 + $0x120] ss:$8 sps:$4 sm:$0xff]   ;;  %v1349_v7 = vld [vmem:[#allocation6 + $0x134] ss:$8 sps:$4 sm:$0xff]   ;;  %v1351_v8 = vld [vmem:[#allocation6 + $0x130] ss:$8 sps:$4 sm:$0xff]  }
  0x3f   :  { %726 = vmatprep.subr.bf16.mxu0 %v1343_v3  ;;  %v1352_v9 = vld [vmem:[#allocation6 + $0x144] ss:$8 sps:$4 sm:$0xff]   ;;  %v1354_v10 = vld [vmem:[#allocation6 + $0x140] ss:$8 sps:$4 sm:$0xff]   ;;  %v1355_v11 = vld [vmem:[#allocation6 + $0x154] ss:$8 sps:$4 sm:$0xff]  }
  0x40   :  { %v1357_v12 = vld [vmem:[#allocation6 + $0x150] ss:$8 sps:$4 sm:$0xff]   ;;  %v1358_v13 = vld [vmem:[#allocation6 + $0x164] ss:$8 sps:$4 sm:$0xff]   ;;  %v1387_v15 = vld [vmem:[#allocation6] ss:$8 sps:$4 sm:$0xff]  }
  0x41   :  { %v1385_v14 = vld [vmem:[#allocation6 + $0x4] ss:$8 sps:$4 sm:$0xff]   ;;  %v1360_v16 = vld [vmem:[#allocation6 + $0x160] ss:$8 sps:$4 sm:$0xff]   ;;  %v1361_v17 = vld [vmem:[#allocation6 + $0x174] ss:$8 sps:$4 sm:$0xff]  }
  0x42   :  { %727 = vmatpush1.bf16.msra.mxu0 %v1345_v4  ;;  %681 = vmatprep.subr.bf16.mxu1 %v1385_v14  ;;  %v1391_v18 = vld [vmem:[#allocation6 + $0x14] ss:$8 sps:$4 sm:$0xff]   ;;  %v1393_v19 = vld [vmem:[#allocation6 + $0x10] ss:$8 sps:$4 sm:$0xff]   ;;  %v84_v21 = vld [vmem:[#allocation3 + $0x48] sm:$0xff]  ;;  %vm1098_vm0 = vcmask 7168  }
  0x43   :  { %728 = vmatprep.subr.bf16.mxu0 %v1346_v5  ;;  %682 = vmatpush1.bf16.msra.mxu1 %v1387_v15  ;;  %v78_v20 = vld [vmem:[#allocation3 + $0x18] sm:$0xff]  ;;  %v1397_v24 = vld [vmem:[#allocation6 + $0x24] ss:$8 sps:$4 sm:$0xff]   ;;  %v1399_v25 = vld [vmem:[#allocation6 + $0x20] ss:$8 sps:$4 sm:$0xff]   ;;  %vm1131_vm1 = vcmask 0  }
  0x44   :  { %683 = vmatprep.subr.bf16.mxu1 %v1391_v18  ;;  %v90_v22 = vpack.c.bf16 %v84_v21, %v78_v20  ;;  %v1363_v23 = vld [vmem:[#allocation6 + $0x170] ss:$8 sps:$4 sm:$0xff]   ;;  %v1364_v26 = vld [vmem:[#allocation6 + $0x184] ss:$8 sps:$4 sm:$0xff]   ;;  %v1366_v27 = vld [vmem:[#allocation6 + $0x180] ss:$8 sps:$4 sm:$0xff]  }
  0x45   :  { %v1403_v28 = vld [vmem:[#allocation6 + $0x34] ss:$8 sps:$4 sm:$0xff]   ;;  %v1405_v30 = vld [vmem:[#allocation6 + $0x30] ss:$8 sps:$4 sm:$0xff]   ;;  %v1409_v31 = vld [vmem:[#allocation6 + $0x44] ss:$8 sps:$4 sm:$0xff]  }
  0x46   :  { %729 = vmatpush1.bf16.msra.mxu0 %v1348_v6  ;;  %756 = vmatprep.mubr.bf16.mxu0 %v90_v22  ;;  %v1367_v29 = vld [vmem:[#allocation6 + $0x194] ss:$8 sps:$4 sm:$0xff]   ;;  %v1369_v32 = vld [vmem:[#allocation6 + $0x190] ss:$8 sps:$4 sm:$0xff]   ;;  %v1370_v33 = vld [vmem:[#allocation6 + $0x1a4] ss:$8 sps:$4 sm:$0xff]  }
  0x47   :  { %730 = vmatprep.subr.bf16.mxu0 %v1349_v7  ;;  %684 = vmatpush1.bf16.msra.mxu1 %v1393_v19  ;;  %v1411_v34 = vld [vmem:[#allocation6 + $0x40] ss:$8 sps:$4 sm:$0xff]   ;;  %v1415_v35 = vld [vmem:[#allocation6 + $0x54] ss:$8 sps:$4 sm:$0xff]   ;;  %v1417_v38 = vld [vmem:[#allocation6 + $0x50] ss:$8 sps:$4 sm:$0xff]  }
  0x48   :  { %685 = vmatprep.subr.bf16.mxu1 %v1397_v24  ;;  %v1372_v36 = vld [vmem:[#allocation6 + $0x1a0] ss:$8 sps:$4 sm:$0xff]   ;;  %v1373_v37 = vld [vmem:[#allocation6 + $0x1b4] ss:$8 sps:$4 sm:$0xff]   ;;  %v1421_v39 = vld [vmem:[#allocation6 + $0x64] ss:$8 sps:$4 sm:$0xff]  }
  0x49   :  { %v1375_v40 = vld [vmem:[#allocation6 + $0x1b0] ss:$8 sps:$4 sm:$0xff]   ;;  %v1376_v41 = vld [vmem:[#allocation6 + $0x1c4] ss:$8 sps:$4 sm:$0xff]   ;;  %v1423_v42 = vld [vmem:[#allocation6 + $0x60] ss:$8 sps:$4 sm:$0xff]  }
  0x4a   :  { %731 = vmatpush1.bf16.msra.mxu0 %v1351_v8  ;;  %v1427_v43 = vld [vmem:[#allocation6 + $0x74] ss:$8 sps:$4 sm:$0xff]   ;;  %v1378_v44 = vld [vmem:[#allocation6 + $0x1c0] ss:$8 sps:$4 sm:$0xff]   ;;  %v1429_v46 = vld [vmem:[#allocation6 + $0x70] ss:$8 sps:$4 sm:$0xff]  }
  0x4b   :  { %732 = vmatprep.subr.bf16.mxu0 %v1352_v9  ;;  %686 = vmatpush1.bf16.msra.mxu1 %v1399_v25  ;;  %v1379_v45 = vld [vmem:[#allocation6 + $0x1d4] ss:$8 sps:$4 sm:$0xff]   ;;  %v1433_v47 = vld [vmem:[#allocation6 + $0x84] ss:$8 sps:$4 sm:$0xff]   ;;  %v1381_v48 = vld [vmem:[#allocation6 + $0x1d0] ss:$8 sps:$4 sm:$0xff]  }
  0x4c   :  { %687 = vmatprep.subr.bf16.mxu1 %v1403_v28  ;;  %v1382_v49 = vld [vmem:[#allocation6 + $0x1e4] ss:$8 sps:$4 sm:$0xff]   ;;  %v1435_v50 = vld [vmem:[#allocation6 + $0x80] ss:$8 sps:$4 sm:$0xff]   ;;  %v1439_v51 = vld [vmem:[#allocation6 + $0x94] ss:$8 sps:$4 sm:$0xff]  }
  0x4d   :  { %v1384_v52 = vld [vmem:[#allocation6 + $0x1e0] ss:$8 sps:$4 sm:$0xff]   ;;  %v1388_v53 = vld [vmem:[#allocation6 + $0x1f4] ss:$8 sps:$4 sm:$0xff]   ;;  %v1441_v54 = vld [vmem:[#allocation6 + $0x90] ss:$8 sps:$4 sm:$0xff]  }
  0x4e   :  { %733 = vmatpush1.bf16.msra.mxu0 %v1354_v10  ;;  %v1445_v55 = vld [vmem:[#allocation6 + $0xa4] ss:$8 sps:$4 sm:$0xff]   ;;  %v1390_v56 = vld [vmem:[#allocation6 + $0x1f0] ss:$8 sps:$4 sm:$0xff]   ;;  %v1447_v60 = vld [vmem:[#allocation6 + $0xa0] ss:$8 sps:$4 sm:$0xff]  }
  0x4f   :  { %734 = vmatprep.subr.bf16.mxu0 %v1355_v11  ;;  %688 = vmatpush1.bf16.msra.mxu1 %v1405_v30  ;;  %v1396_v57 = vld [vmem:[#allocation6 + $0x204] ss:$8 sps:$4 sm:$0xff]   ;;  %v77_v58 = vld [vmem:[#allocation3 + $0x10] sm:$0xff]  ;;  %v1394_v62 = vld [vmem:[#allocation6 + $0x200] ss:$8 sps:$4 sm:$0xff]  }
  0x50   :  { %689 = vmatprep.subr.bf16.mxu1 %v1409_v31  ;;  %v83_v59 = vld [vmem:[#allocation3 + $0x40] sm:$0xff]  ;;  %v1451_v61 = vld [vmem:[#allocation6 + $0xb4] ss:$8 sps:$4 sm:$0xff]   ;;  %v1453_v1 = vld [vmem:[#allocation6 + $0xb0] ss:$8 sps:$4 sm:$0xff]  }
  0x51   :  { %v89_v63 = vpack.c.bf16 %v83_v59, %v77_v58  ;;  %v1402_v0 = vld [vmem:[#allocation6 + $0x214] ss:$8 sps:$4 sm:$0xff]   ;;  %v1457_v2 = vld [vmem:[#allocation6 + $0xc4] ss:$8 sps:$4 sm:$0xff]   ;;  %v1400_v6 = vld [vmem:[#allocation6 + $0x210] ss:$8 sps:$4 sm:$0xff]  }
  0x52   :  { %735 = vmatpush1.bf16.msra.mxu0 %v1357_v12  ;;  %v76_v3 = vld [vmem:[#allocation3 + $0x8] sm:$0xff]  ;;  %v82_v4 = vld [vmem:[#allocation3 + $0x38] sm:$0xff]  ;;  %v75_v24 = vld [vmem:[#allocation3] sm:$0xff] }
  0x53   :  { %736 = vmatprep.subr.bf16.mxu0 %v1358_v13  ;;  %690 = vmatpush1.bf16.msra.mxu1 %v1411_v34  ;;  %v88_v5 = vpack.c.bf16 %v82_v4, %v76_v3  ;;  %v80_v7 = vld [vmem:[#allocation3 + $0x28] sm:$0xff]  ;;  %v86_v10 = vld [vmem:[#allocation3 + $0x58] sm:$0xff]  ;;  %v81_v25 = vld [vmem:[#allocation3 + $0x30] sm:$0xff] }
  0x54   :  { %691 = vmatprep.subr.bf16.mxu1 %v1415_v35  ;;  %v1408_v8 = vld [vmem:[#allocation6 + $0x224] ss:$8 sps:$4 sm:$0xff]   ;;  %v1459_v9 = vld [vmem:[#allocation6 + $0xc0] ss:$8 sps:$4 sm:$0xff]   ;;  %v1463_v11 = vld [vmem:[#allocation6 + $0xd4] ss:$8 sps:$4 sm:$0xff]   ;;  %v92_v12 = vpack.c.bf16 %v86_v10, %v80_v7  ;;  %v87_v28 = vpack.c.bf16 %v81_v25, %v75_v24 }
  0x55   :  { %713 = vmatprep.mubr.bf16.mxu1 %v88_v5  ;;  %v1406_v13 = vld [vmem:[#allocation6 + $0x220] ss:$8 sps:$4 sm:$0xff]   ;;  %v1414_v14 = vld [vmem:[#allocation6 + $0x234] ss:$8 sps:$4 sm:$0xff]   ;;  %v1465_v15 = vld [vmem:[#allocation6 + $0xd0] ss:$8 sps:$4 sm:$0xff]  }
  0x56   :  { %737 = vmatpush1.bf16.msra.mxu0 %v1360_v16  ;;  %v1469_v16 = vld [vmem:[#allocation6 + $0xe4] ss:$8 sps:$4 sm:$0xff]   ;;  %v1471_v19 = vld [vmem:[#allocation6 + $0xe0] ss:$8 sps:$4 sm:$0xff]   ;;  %v1475_v20 = vld [vmem:[#allocation6 + $0xf4] ss:$8 sps:$4 sm:$0xff]  }
  0x57   :  { %738 = vmatprep.subr.bf16.mxu0 %v1361_v17  ;;  %692 = vmatpush1.bf16.msra.mxu1 %v1417_v38  ;;  %v1412_v17 = vld [vmem:[#allocation6 + $0x230] ss:$8 sps:$4 sm:$0xff]   ;;  %v1420_v18 = vld [vmem:[#allocation6 + $0x244] ss:$8 sps:$4 sm:$0xff]   ;;  %v1418_v21 = vld [vmem:[#allocation6 + $0x240] ss:$8 sps:$4 sm:$0xff]  }
  0x58   :  { %693 = vmatprep.subr.bf16.mxu1 %v1421_v39  ;;  %v1426_v22 = vld [vmem:[#allocation6 + $0x254] ss:$8 sps:$4 sm:$0xff]   ;;  %v1484_v30 = vld [vmem:[#allocation8] ss:$8 sps:$4 sm:$0xff]   ;;  %v1492_v35 = vld [vmem:[#allocation8 + $0x24] ss:$8 sps:$4 sm:$0xff]  }
  0x59   :  { %v1489_v31 = vld [vmem:[#allocation8 + $0x14] ss:$8 sps:$4 sm:$0xff]   ;;  %v1444_v38 = vld [vmem:[#allocation6 + $0x284] ss:$8 sps:$4 sm:$0xff]   ;;  %v1481_v4 = vld [vmem:[#allocation6 + $0x2f0] ss:$8 sps:$4 sm:$0xff]  }
  0x5a   :  { %739 = vmatpush1.bf16.msra.mxu0 %v1363_v23  ;;  %v1477_v23 = vld [vmem:[#allocation6 + $0xf0] ss:$8 sps:$4 sm:$0xff]   ;;  %v1438_v34 = vld [vmem:[#allocation6 + $0x274] ss:$8 sps:$4 sm:$0xff]   ;;  %v1510_v59 = vld [vmem:[#allocation8 + $0x84] ss:$8 sps:$4 sm:$0xff]  }
  0x5b   :  { %740 = vmatprep.subr.bf16.mxu0 %v1364_v26  ;;  %694 = vmatpush1.bf16.msra.mxu1 %v1423_v42  ;;  %v1486_v26 = vld [vmem:[#allocation8 + $0x4] ss:$8 sps:$4 sm:$0xff]   ;;  %v1495_v39 = vld [vmem:[#allocation8 + $0x34] ss:$8 sps:$4 sm:$0xff]   ;;  %v1514_v7 = vld [vmem:[#allocation8 + $0xa0] ss:$8 sps:$4 sm:$0xff]  }
  0x5c   :  { %695 = vmatprep.subr.bf16.mxu1 %v1427_v43  ;;  %v1450_v42 = vld [vmem:[#allocation6 + $0x294] ss:$8 sps:$4 sm:$0xff]   ;;  %v1498_v43 = vld [vmem:[#allocation8 + $0x44] ss:$8 sps:$4 sm:$0xff]   ;;  %v1517_v10 = vld [vmem:[#allocation8 + $0xb0] ss:$8 sps:$4 sm:$0xff]  }
  0x5d   :  { %v1474_v58 = vld [vmem:[#allocation6 + $0x2d4] ss:$8 sps:$4 sm:$0xff]   ;;  %v1516_v3 = vld [vmem:[#allocation8 + $0xa4] ss:$8 sps:$4 sm:$0xff]  }
  0x5e   :  { %741 = vmatpush1.bf16.msra.mxu0 %v1366_v27  ;;  %v1424_v27 = vld [vmem:[#allocation6 + $0x250] ss:$8 sps:$4 sm:$0xff]   ;;  %v79_v5 = vld [vmem:[#allocation3 + $0x20] sm:$0xff] }
  0x5f   :  { %742 = vmatprep.subr.bf16.mxu0 %v1367_v29  ;;  %696 = vmatpush1.bf16.msra.mxu1 %v1429_v46  ;;  %v1432_v29 = vld [vmem:[#allocation6 + $0x264] ss:$8 sps:$4 sm:$0xff]  }
  0x60   :  { %697 = vmatprep.subr.bf16.mxu1 %v1433_v47  ;;  %v1456_v46 = vld [vmem:[#allocation6 + $0x2a4] ss:$8 sps:$4 sm:$0xff]   ;;  %v1501_v47 = vld [vmem:[#allocation8 + $0x54] ss:$8 sps:$4 sm:$0xff]  }
  0x62   :  { %743 = vmatpush1.bf16.msra.mxu0 %v1369_v32  ;;  %v1430_v32 = vld [vmem:[#allocation6 + $0x260] ss:$8 sps:$4 sm:$0xff]  }
  0x63   :  { %744 = vmatprep.subr.bf16.mxu0 %v1370_v33  ;;  %698 = vmatpush1.bf16.msra.mxu1 %v1435_v50  ;;  %v1487_v33 = vld [vmem:[#allocation8 + $0x10] ss:$8 sps:$4 sm:$0xff]   ;;  %v1462_v50 = vld [vmem:[#allocation6 + $0x2b4] ss:$8 sps:$4 sm:$0xff]  }
  0x64   :  { %699 = vmatprep.subr.bf16.mxu1 %v1439_v51  ;;  %v1504_v51 = vld [vmem:[#allocation8 + $0x64] ss:$8 sps:$4 sm:$0xff]  }
  0x66   :  { %745 = vmatpush1.bf16.msra.mxu0 %v1372_v36  ;;  %v1436_v36 = vld [vmem:[#allocation6 + $0x270] ss:$8 sps:$4 sm:$0xff]  }
  0x67   :  { %746 = vmatprep.subr.bf16.mxu0 %v1373_v37  ;;  %700 = vmatpush1.bf16.msra.mxu1 %v1441_v54  ;;  %v1490_v37 = vld [vmem:[#allocation8 + $0x20] ss:$8 sps:$4 sm:$0xff]   ;;  %v1468_v54 = vld [vmem:[#allocation6 + $0x2c4] ss:$8 sps:$4 sm:$0xff]  }
  0x68   :  { %701 = vmatprep.subr.bf16.mxu1 %v1445_v55  ;;  %v1507_v55 = vld [vmem:[#allocation8 + $0x74] ss:$8 sps:$4 sm:$0xff]  }
  0x6a   :  { %747 = vmatpush1.bf16.msra.mxu0 %v1375_v40  ;;  %v1442_v40 = vld [vmem:[#allocation6 + $0x280] ss:$8 sps:$4 sm:$0xff]  }
  0x6b   :  { %748 = vmatprep.subr.bf16.mxu0 %v1376_v41  ;;  %702 = vmatpush1.bf16.msra.mxu1 %v1447_v60  ;;  %v1493_v41 = vld [vmem:[#allocation8 + $0x30] ss:$8 sps:$4 sm:$0xff]  }
  0x6c   :  { %703 = vmatprep.subr.bf16.mxu1 %v1451_v61  ;;  %v1472_v60 = vld [vmem:[#allocation6 + $0x2d0] ss:$8 sps:$4 sm:$0xff]   ;;  %v1508_v61 = vld [vmem:[#allocation8 + $0x80] ss:$8 sps:$4 sm:$0xff]  }
  0x6e   :  { %749 = vmatpush1.bf16.msra.mxu0 %v1378_v44  ;;  %v1448_v44 = vld [vmem:[#allocation6 + $0x290] ss:$8 sps:$4 sm:$0xff]  }
  0x6f   :  { %750 = vmatprep.subr.bf16.mxu0 %v1379_v45  ;;  %704 = vmatpush1.bf16.msra.mxu1 %v1453_v1  ;;  %v1496_v45 = vld [vmem:[#allocation8 + $0x40] ss:$8 sps:$4 sm:$0xff]   ;;  %v1511_v1 = vld [vmem:[#allocation8 + $0x90] ss:$8 sps:$4 sm:$0xff]  }
  0x70   :  { %705 = vmatprep.subr.bf16.mxu1 %v1457_v2  ;;  %v1483_v2 = vld [vmem:[#allocation6 + $0x2f4] ss:$8 sps:$4 sm:$0xff]  }
  0x72   :  { %751 = vmatpush1.bf16.msra.mxu0 %v1381_v48  ;;  %v1454_v48 = vld [vmem:[#allocation6 + $0x2a0] ss:$8 sps:$4 sm:$0xff]  }
  0x73   :  { %752 = vmatprep.subr.bf16.mxu0 %v1382_v49  ;;  %706 = vmatpush1.bf16.msra.mxu1 %v1459_v9  ;;  %v1499_v49 = vld [vmem:[#allocation8 + $0x50] ss:$8 sps:$4 sm:$0xff]  }
  0x74   :  { %707 = vmatprep.subr.bf16.mxu1 %v1463_v11  ;;  %v1520_v11 = vld [vmem:[#allocation8 + $0xc0] ss:$8 sps:$4 sm:$0xff]  }
  0x76   :  { %753 = vmatpush1.bf16.msra.mxu0 %v1384_v52  ;;  %v1460_v52 = vld [vmem:[#allocation6 + $0x2b0] ss:$8 sps:$4 sm:$0xff]  }
  0x77   :  { %754 = vmatprep.subr.bf16.mxu0 %v1388_v53  ;;  %708 = vmatpush1.bf16.msra.mxu1 %v1465_v15  ;;  %v1502_v53 = vld [vmem:[#allocation8 + $0x60] ss:$8 sps:$4 sm:$0xff]   ;;  %v1528_v15 = vld [vmem:[#allocation8 + $0xe4] ss:$8 sps:$4 sm:$0xff]  }
  0x78   :  { %709 = vmatprep.subr.bf16.mxu1 %v1469_v16  ;;  %v1526_v16 = vld [vmem:[#allocation8 + $0xe0] ss:$8 sps:$4 sm:$0xff]  }
  0x7a   :  { %755 = vmatpush1.bf16.msra.mxu0 %v1390_v56  ;;  %v1466_v56 = vld [vmem:[#allocation6 + $0x2c0] ss:$8 sps:$4 sm:$0xff]  }
  0x7b   :  { %767 = vmatprep.subr.bf16.mxu0 %v1396_v57  ;;  %710 = vmatpush1.bf16.msra.mxu1 %v1471_v19  ;;  %v1505_v57 = vld [vmem:[#allocation8 + $0x70] ss:$8 sps:$4 sm:$0xff]  }
  0x7c   :  { %711 = vmatprep.subr.bf16.mxu1 %v1475_v20 }
  0x7d   :  { %757 = vmatmul.mubr.bf16.vlgmr.msra.gmra.mrb[0].mxu0 %v89_v63  ;;  %v1513_v63 = vld [vmem:[#allocation8 + $0x94] ss:$8 sps:$4 sm:$0xff]  }
  0x7e   :  { %768 = vmatpush1.bf16.msra.mxu0 %v1394_v62  ;;  %799 = vmatprep.mubr.bf16.mxu0 %v92_v12  ;;  %v1480_v62 = vld [vmem:[#allocation6 + $0x2e4] ss:$8 sps:$4 sm:$0xff]  }
  0x7f   :  { %769 = vmatprep.subr.bf16.mxu0 %v1402_v0  ;;  %712 = vmatpush1.bf16.msra.mxu1 %v1477_v23  ;;  %v1478_v0 = vld [vmem:[#allocation6 + $0x2e0] ss:$8 sps:$4 sm:$0xff]   ;;  %v1522_v12 = vld [vmem:[#allocation8 + $0xc4] ss:$8 sps:$4 sm:$0xff]   ;;  %v191_v23 = vlaneseq }
  0x80   :  { %1020 = vmatprep.subr.bf16.mxu1 %v1486_v26  ;;  %v189_v26 = vld [vmem:[%s1759_s3] sm:$0x3] }
  0x81   :  { %v192_v24 = vshrl.u32 %v191_v23, 7 }
  0x82   :  { %770 = vmatpush1.bf16.msra.mxu0 %v1400_v6  ;;  %714 = vmatmul.mubr.bf16.vlgmr.msra.gmra.mrb[0].mxu1 %v87_v28  ;;  %v85_v6 = vld [vmem:[#allocation3 + $0x50] sm:$0xff] }
  0x83   :  { %771 = vmatprep.subr.bf16.mxu0 %v1408_v8  ;;  %1021 = vmatpush1.bf16.msra.mxu1 %v1484_v30  ;;  %v1519_v8 = vld [vmem:[#allocation8 + $0xb4] ss:$8 sps:$4 sm:$0xff]   ;;  %v91_v9 = vpack.c.bf16 %v85_v6, %v79_v5  ;;  %v193_v25 = vsub.s32 0, %v192_v24 }
  0x84   :  { %1022 = vmatprep.subr.bf16.mxu1 %v1489_v31 }
  0x85   :  { %v194_v28 = vrot.slane %v189_v26, %v193_v25 }
  0x86   :  { %772 = vmatpush1.bf16.msra.mxu0 %v1406_v13  ;;  %v1523_v13 = vld [vmem:[#allocation8 + $0xd0] ss:$8 sps:$4 sm:$0xff]  }
  0x87   :  { %773 = vmatprep.subr.bf16.mxu0 %v1414_v14  ;;  %1023 = vmatpush1.bf16.msra.mxu1 %v1487_v33  ;;  %v1525_v14 = vld [vmem:[#allocation8 + $0xd4] ss:$8 sps:$4 sm:$0xff]  }
  0x88   :  { %1024 = vmatprep.subr.bf16.mxu1 %v1492_v35 }
  0x8a   :  { %774 = vmatpush1.bf16.msra.mxu0 %v1412_v17  ;;  %v1531_v17 = vld [vmem:[#allocation8 + $0xf4] ss:$8 sps:$4 sm:$0xff]  }
  0x8b   :  { %775 = vmatprep.subr.bf16.mxu0 %v1420_v18  ;;  %1025 = vmatpush1.bf16.msra.mxu1 %v1490_v37  ;;  %v1529_v18 = vld [vmem:[#allocation8 + $0xf0] ss:$8 sps:$4 sm:$0xff]  }
  0x8c   :  { %1026 = vmatprep.subr.bf16.mxu1 %v1495_v39 }
  0x8e   :  { %776 = vmatpush1.bf16.msra.mxu0 %v1418_v21 }
  0x8f   :  { %777 = vmatprep.subr.bf16.mxu0 %v1426_v22  ;;  %1027 = vmatpush1.bf16.msra.mxu1 %v1493_v41 }
  0x90   :  { %1028 = vmatprep.subr.bf16.mxu1 %v1498_v43 }
  0x92   :  { %778 = vmatpush1.bf16.msra.mxu0 %v1424_v27  ;;  %v197_v27 = vsub.s32 1, %v192_v24 }
  0x93   :  { %779 = vmatprep.subr.bf16.mxu0 %v1432_v29  ;;  %1029 = vmatpush1.bf16.msra.mxu1 %v1496_v45 }
  0x94   :  { %1030 = vmatprep.subr.bf16.mxu1 %v1501_v47  ;;  %v198_v29 = vrot.slane %v189_v26, %v197_v27 }
  0x96   :  { %780 = vmatpush1.bf16.msra.mxu0 %v1430_v32 }
  0x97   :  { %781 = vmatprep.subr.bf16.mxu0 %v1438_v34  ;;  %1031 = vmatpush1.bf16.msra.mxu1 %v1499_v49 }
  0x98   :  { %1032 = vmatprep.subr.bf16.mxu1 %v1504_v51  ;;  %v1067_v51 = vld [vmem:[%s1762_s6] sm:$0x3] }
  0x9a   :  { %782 = vmatpush1.bf16.msra.mxu0 %v1436_v36 }
  0x9b   :  { %783 = vmatprep.subr.bf16.mxu0 %v1444_v38  ;;  %1033 = vmatpush1.bf16.msra.mxu1 %v1502_v53 }
  0x9c   :  { %1034 = vmatprep.subr.bf16.mxu1 %v1507_v55  ;;  %v1072_v55 = vrot.slane %v1067_v51, %v193_v25 }
  0x9e   :  { %784 = vmatpush1.bf16.msra.mxu0 %v1442_v40 }
  0x9f   :  { %785 = vmatprep.subr.bf16.mxu0 %v1450_v42  ;;  %1035 = vmatpush1.bf16.msra.mxu1 %v1505_v57 }
  0xa0   :  { %1036 = vmatprep.subr.bf16.mxu1 %v1510_v59 }
  0xa2   :  { %786 = vmatpush1.bf16.msra.mxu0 %v1448_v44 }
  0xa3   :  { %787 = vmatprep.subr.bf16.mxu0 %v1456_v46  ;;  %1037 = vmatpush1.bf16.msra.mxu1 %v1508_v61 }
  0xa4   :  { %1038 = vmatprep.subr.bf16.mxu1 %v1513_v63 }
  0xa6   :  { %788 = vmatpush1.bf16.msra.mxu0 %v1454_v48  ;;  %v848_v48 = vld [vmem:[%s1761_s5] sm:$0x3] }
  0xa7   :  { %789 = vmatprep.subr.bf16.mxu0 %v1462_v50  ;;  %1039 = vmatpush1.bf16.msra.mxu1 %v1511_v1  ;;  %v853_v49 = vrot.slane %v848_v48, %v193_v25  ;;  %v857_v50 = vrot.slane %v848_v48, %v197_v27 }
  0xa8   :  { %1040 = vmatprep.subr.bf16.mxu1 %v1516_v3 }
  0xaa   :  { %790 = vmatpush1.bf16.msra.mxu0 %v1460_v52 }
  0xab   :  { %791 = vmatprep.subr.bf16.mxu0 %v1468_v54  ;;  %1041 = vmatpush1.bf16.msra.mxu1 %v1514_v7 }
  0xac   :  { %1042 = vmatprep.subr.bf16.mxu1 %v1519_v8  ;;  %v1317_v8 = vld [vmem:[#allocation2] ss:$0 sm:$0xff] }
  0xae   :  { %792 = vmatpush1.bf16.msra.mxu0 %v1466_v56 }
  0xaf   :  { %793 = vmatprep.subr.bf16.mxu0 %v1474_v58  ;;  %1043 = vmatpush1.bf16.msra.mxu1 %v1517_v10  ;;  %v1076_v58 = vrot.slane %v1067_v51, %v197_v27 }
  0xb0   :  { %1044 = vmatprep.subr.bf16.mxu1 %v1522_v12 }
  0xb2   :  { %794 = vmatpush1.bf16.msra.mxu0 %v1472_v60 }
  0xb3   :  { %795 = vmatprep.subr.bf16.mxu0 %v1480_v62  ;;  %1045 = vmatpush1.bf16.msra.mxu1 %v1520_v11 }
  0xb4   :  { %1046 = vmatprep.subr.bf16.mxu1 %v1525_v14 }
  0xb6   :  { %796 = vmatpush1.bf16.msra.mxu0 %v1478_v0 }
  0xb7   :  { %797 = vmatprep.subr.bf16.mxu0 %v1483_v2  ;;  %1047 = vmatpush1.bf16.msra.mxu1 %v1523_v13 }
  0xb8   :  { %1048 = vmatprep.subr.bf16.mxu1 %v1528_v15 }
  0xba   :  { %798 = vmatpush1.bf16.msra.mxu0 %v1481_v4 }
  0xbb   :  { %1049 = vmatpush1.bf16.msra.mxu1 %v1526_v16 }
  0xbc   :  { %1050 = vmatprep.subr.bf16.mxu1 %v1531_v17 }
  0xbd   :  { %800 = vmatmul.mubr.bf16.vlgmr.msra.gmra.mrb[0].mxu0 %v91_v9  ;;  %v1110_v9 = vld [vmem:[%s1757_s1] sm:$0xff]  ;;  %s1633_s1 = smov [#allocation10]  }
  0xbe   :  { %s1173_s13 = sshll.u32 %s1633_s1, 4  ;;  %s1174_s13 = int_to_ptr.vmem [resolvable:$true] %s1173_s13 }
  0xbf   :  { %1051 = vmatpush1.bf16.msra.mxu1 %v1529_v18  ;;  %s1598_s12 = scalar_lea.vmem %s1174_s13, 16  ;;  %s1602_s14 = scalar_lea.vmem %s1174_s13, 32 }
  0xc0   :  { %p1599_p10 = scmp.ne.s32.totalorder %s1174_s13, %s1598_s12  ;;  %p1603_p11 = scmp.lt.s32.totalorder %s1174_s13, %s1174_s13 }
  0xc1   :  { %p1604_p12 = scmp.lt.s32.totalorder %s1602_s14, %s1598_s12 }
  0xc3   :  { %p1605_p13 = por %p1604_p12, %p1603_p11 }
  0xc5   :  { %p1606_p0 = pnand %p1605_p13, %p1599_p10 }
 0x155   :  { %v715_v19 = vpop.f32.mrb[0].mxu1 }
 0x156   :  { %v717_v20 = vpop.f32.mrb[1].mxu1  ;;  %v716_v30 = vadd.f32 %v715_v19, %v194_v28 }
 0x157   :  { %v719_v21 = vpop.f32.mrb[2].mxu1  ;;  %v718_v31 = vadd.f32 %v717_v20, %v198_v29 }
 0x158   :  { %v721_v22 = vpop.f32.mrb[3].mxu1  ;;  %v720_v33 = vadd.f32 %v719_v21, %v194_v28 }
 0x159   :  { %v722_v36 = vadd.f32 %v721_v22, %v198_v29 }
 0x190   :  { %v801_v32 = vpop.f32.mrb[0].mxu0 }
 0x191   :  { %v1319_v34 = vadd.f32 %v801_v32, %v716_v30  ;;  %v803_v35 = vpop.f32.mrb[1].mxu0 }
 0x192   :  { %v1321_v37 = vadd.f32 %v803_v35, %v718_v31  ;;  %v805_v38 = vpop.f32.mrb[2].mxu0 }
 0x193   :  { %v1323_v39 = vadd.f32 %v805_v38, %v720_v33  ;;  %v807_v40 = vpop.f32.mrb[3].mxu0  ;;  %v810_v42 = vmax.f32 %v1319_v34, 0.0 }
 0x194   :  { %v1325_v41 = vadd.f32 %v807_v40, %v722_v36  ;;  %v811_v44 = vmax.f32 %v1321_v37, 0.0 }
 0x195   :  { %v812_v43 = vmax.f32 %v1323_v39, 0.0 }
 0x196   :  { %v813_v45 = vmax.f32 %v1325_v41, 0.0 }
 0x197   :  { %v814_v46 = vpack.c.bf16 %v812_v43, %v810_v42 }
 0x198   :  { %v815_v47 = vpack.c.bf16 %v813_v45, %v811_v44 }
 0x19a   :  { %1052 = vmatprep.mubr.bf16.mxu1 %v815_v47 }
 0x19b   :  { %1053 = vmatmul.mubr.bf16.vlgmr.msra.gmra.mrb[4].mxu1 %v814_v46 }
 0x26e   :  { %v1054_v52 = vpop.f32.mrb[4].mxu1 }
 0x26f   :  { %v1055_v53 = vadd.f32 %v1054_v52, %v853_v49  ;;  %v1056_v54 = vpop.f32.mrb[5].mxu1 }
 0x270   :  { %v1057_v56 = vadd.f32 %v1056_v54, %v857_v50  ;;  %v1058_v57 = vpop.f32.mrb[6].mxu1 }
 0x271   :  { %v1063_v59 = vmax.f32 %v1055_v53, 0.0  ;;  %v1059_v60 = vadd.f32 %v1058_v57, %v853_v49  ;;  %v1060_v61 = vpop.f32.mrb[7].mxu1 }
 0x272   :  { %v1064_v62 = vmax.f32 %v1057_v56, 0.0  ;;  %v1061_v63 = vadd.f32 %v1060_v61, %v857_v50 }
 0x273   :  { %v1065_v0 = vmax.f32 %v1059_v60, 0.0  ;;  %v1079_v1 = vmul.f32 %v1072_v55, %v1063_v59 }
 0x274   :  { %v1066_v2 = vmax.f32 %v1061_v63, 0.0  ;;  %v1080_v3 = vmul.f32 %v1076_v58, %v1064_v62 }
 0x275   :  { %v1081_v4 = vmul.f32 %v1072_v55, %v1065_v0 }
 0x276   :  { %v1083_v5 = vadd.f32 %v1080_v3, %v1079_v1  ;;  %v1082_v6 = vmul.f32 %v1076_v58, %v1066_v2 }
 0x278   :  { %1084 = vadd.xlane.f32.xlu0 %v1083_v5  ;;  %v1086_v7 = vadd.f32 %v1082_v6, %v1081_v4 }
 0x27a   :  { %1087 = vadd.xlane.f32.xlu1 %v1086_v7 }
 0x305   :  { %v1085_v10 = vpop.xlane.xlu0 %1084 }
 0x306   :  { %v1096_v11 = vadd.f32 %v1317_v8, %v1085_v10 }
 0x307   :  { %v1088_v12 = vpop.xlane.xlu1 %1087 }
 0x308   :  { %v1112_v13 = vsub.f32 %v1096_v11, %v1110_v9  ;;  %1099 = vst.msk [vmem:[#allocation9] sm:$0xff] %vm1098_vm0, %v1096_v11 }
 0x30a   :  { %v1116_v14 = vmul.f32 %v1112_v13, %v1112_v13 }
 0x30c   :  { %v1118_v15 = vsel %vm1098_vm0, %v1116_v14, 0.0 }
 0x30d   :  { %1121 = vadd.xlane.f32.xlu0 %v1118_v15 }
 0x30f   :  { %v1162_v16 = vld [vmem:[#allocation9] sm:$0xff] }
 0x310   :  { %1163 = vst [vmem:[%s1764_s8] sm:$0xff] %v1162_v16 }
 0x39a   :  { %v1122_v17 = vpop.xlane.xlu0 %1121 }
 0x39b   :  { %v1123_v18 = vrot.slane %v1122_v17, 4 }
 0x39d   :  { %v1124_v19 = vadd.f32 %v1123_v18, %v1122_v17 }
 0x39f   :  { %v1125_v20 = vrot.slane %v1124_v19, 2 }
 0x3a1   :  { %v1126_v21 = vadd.f32 %v1125_v20, %v1124_v19 }
 0x3a3   :  { %v1127_v22 = vrot.slane %v1126_v21, 1 }
 0x3a5   :  { %v1128_v23 = vadd.f32 %v1127_v22, %v1126_v21 }
 0x3a7   :  { %1330 = vpush %v1128_v23 }
 0x3d8   :  { %s1331_s2 = spop %1330 }
 0x3d9   :  { %v1130_v24 = vstv %s1331_s2 }
 0x3da   :  { %1132 = vst.msk [vmem:[#allocation10] sm:$0x1] %vm1131_vm1, %v1130_v24 }
 0x3db   :  { %1609 = shalt.err (!%p1606_p0)
}
 0x3dc   :  { %s1610_s16 = scalar_lea.hbm %s1765_s9, 16 }
 0x3dd   :  { %p1611_p1 = scmp.ne.s32.totalorder %s1765_s9, %s1610_s16  ;;  %p1614_p2 = scmp.lt.u32.totalorder %s1610_s16, %s1765_s9 }
 0x3df   :  { %p1616_p3 = pnand %p1614_p2, %p1611_p1 }
 0x3e1   :  { %1619 = shalt.err (!%p1616_p3)
}
 0x3e2   :  { %1176 = dma.vmem_to_hbm [thread:$0]  %s1174_s13, 16, %s1765_s9, [#allocation5]  }
 0x3e3   :  { %1624 = dma.done.wait [#allocation5], 16  }
 0x3e4   :  { %1625 = vsyncadd [#allocation5], 4294967280 }
 0x3e5   :  { %1182 = vsyncpa [#allocation4], 1 }
 0x3e6   :  { %1183 = vsyncpa [#allocation7], 1 }
 0x3e7   :  { %1184 = vsyncpa [#allocation5], 1 }

</bundles_post_ra>
